<compile_context>
chip_gen: v7x
topology: tpu7x:2x2x1
jax: 0.10.0
libtpu: 0.0.40
codegen_flags: <defaults>
</compile_context>

<pallas_src>
import numpy as np
import jax
import jax.numpy as jnp
from jax.experimental import pallas as pl
from jax.experimental.pallas import tpu as pltpu


# ---- patch-stack layout constants (3x3 conv, dy-major / dx-minor taps) -----
N_TAPS = 9                    # 3x3
XS_LO = 9                     # rows [0, 9)  : INTERPOLATED (cond) taps
NZ_LO = 18                    # rows [9, 18) : HR (x_start) taps  -> * sqrt_ac[t]
NZ_HI = 27                    # rows [18,27) : noise taps         -> * sqrt_1m_ac[t]
NZ_CENTER = NZ_LO + 4         # raw-noise center tap (dy=1, dx=1) == eps target
                              # rows [27, 27+B): per-batch one-hot (carries b1 + temb)


# ----------------------------- schedule (numpy, like register_schedule) -----
def ddpm_schedule(timesteps, linear_start=1e-4, linear_end=2e-2, v_posterior=0.0):
    betas = np.linspace(linear_start, linear_end, timesteps, dtype=np.float64)
    alphas = 1.0 - betas
    alphas_cumprod = np.cumprod(alphas)
    alphas_cumprod_prev = np.append(1.0, alphas_cumprod[:-1])
    sqrt_ac = np.sqrt(alphas_cumprod)
    sqrt_1m_ac = np.sqrt(1.0 - alphas_cumprod)
    posterior_variance = ((1 - v_posterior) * betas * (1.0 - alphas_cumprod_prev)
                          / (1.0 - alphas_cumprod) + v_posterior * betas)
    with np.errstate(divide="ignore", invalid="ignore"):
        lvlb = betas ** 2 / (2 * posterior_variance * alphas * (1 - alphas_cumprod))
    lvlb[0] = lvlb[1]  # eps parameterization fix-up, as in register_schedule
    return (jnp.asarray(sqrt_ac, jnp.float32),
            jnp.asarray(sqrt_1m_ac, jnp.float32),
            jnp.asarray(lvlb, jnp.float32))


def timestep_embedding(t, dim):
    half = dim // 2
    freqs = jnp.exp(-np.log(10000.0) * jnp.arange(half, dtype=jnp.float32) / half)
    args = t.astype(jnp.float32)[:, None] * freqs[None, :]
    return jnp.concatenate([jnp.cos(args), jnp.sin(args)], axis=-1)


# ----------------------------- Pallas kernel --------------------------------
def ddpm_p_losses_kernel(b2_ref,    # SMEM [1]          conv1x1 bias
                         a_ref,     # VMEM [K, mt]      stacked taps + batch one-hot
                         sa_ref,    # VMEM [1, mt]      sqrt_alphas_cumprod[t] per lane
                         soma_ref,  # VMEM [1, mt]      sqrt_1m_alphas_cumprod[t] per lane
                         w1_ref,    # VMEM [hidden, K]  fused conv3x3 + bias + temb
                         w2_ref,    # VMEM [1, hidden]  conv1x1 weights
                         seg_ref,   # VMEM [mt, B]      one-hot(batch) * wfac / HW
                         o_ref):    # VMEM [1, B]       per-batch loss (accum over M tiles)
    @pl.when(pl.program_id(0) == 0)
    def _():
        o_ref[...] = jnp.zeros_like(o_ref)

    a = a_ref[...]                                            # (K, mt), lane-dense

    # q_sample fused into the matmul operand: scale x_start rows by sqrt_ac[t]
    # and noise rows by sqrt_1m_ac[t]; cond + one-hot rows stay at 1.
    k_idx = jax.lax.broadcasted_iota(jnp.int32, a.shape, 0)
    scale = jnp.where((k_idx < XS_LO) | (k_idx >= NZ_HI), 1.0,
                      jnp.where(k_idx < NZ_LO, sa_ref[...], soma_ref[...]))
    x = a * scale                                             # (K, mt)

    # layer 1: conv3x3(2->hidden) + bias + timestep embedding — ONE MXU matmul
    h = jnp.dot(w1_ref[...], x, preferred_element_type=jnp.float32)   # (hidden, mt)
    h = jnp.maximum(h, 0.0)

    # layer 2: conv1x1(hidden->1) — MXU matmul, lane-dense (1, mt) result
    pred = jnp.dot(w2_ref[...], h, preferred_element_type=jnp.float32) + b2_ref[0]

    # eps loss: target is the raw noise (center tap, cheap sublane row)
    d = pred - a[NZ_CENTER:NZ_CENTER + 1, :]                  # (1, mt)
    # per-batch segment reduction; (l_simple + elbo*lvlb[t]) / HW folded into seg
    o_ref[...] += jnp.dot(d * d, seg_ref[...], preferred_element_type=jnp.float32)


# ----------------------------- wrapper ---------------------------------------
def ddpm_forward(x_hr, x_interp, t, noise, params, sched,
                 l_simple_weight=1.0, original_elbo_weight=0.0):
    """x_hr / x_interp / noise: [B, 1, H, W] float32 (NCHW, like PyTorch)."""
    sqrt_ac, sqrt_1m_ac, lvlb = sched
    B, C, H, W = x_hr.shape
    assert C == 1  # per-batch mean divides by HW only (C == 1 in this model)
    HW = H * W
    M = B * HW
    hidden = params["w1"].shape[-1]

    # per-batch scalars -> per-lane rows; loss weight folded into segment matrix
    sa_row = jnp.repeat(sqrt_ac[t], HW)[None, :].astype(jnp.float32)        # (1, M)
    soma_row = jnp.repeat(sqrt_1m_ac[t], HW)[None, :].astype(jnp.float32)   # (1, M)
    wfac = (l_simple_weight + original_elbo_weight * lvlb[t]).astype(jnp.float32)  # (B,)

    batch_idx = jnp.arange(M, dtype=jnp.int32) // HW
    onehot = jax.nn.one_hot(batch_idx, B, dtype=jnp.float32)                # (M, B)
    seg = onehot * (wfac / HW)[None, :]                                     # (M, B)

    # transposed lane-dense im2col: (9, B*HW), batch folded into lanes
    # TODO(synk): for large H,W build the taps in-kernel from raw padded images
    # (memory_space=pl.ANY + make_async_copy) to avoid the 9x im2col HBM expansion.
    def im2col3x3_T(x):  # [B,1,H,W] -> [9, B*HW]
        xp = jnp.pad(x[:, 0], ((0, 0), (1, 1), (1, 1)))
        cols = [xp[:, dy:dy + H, dx:dx + W].reshape(M)
                for dy in range(3) for dx in range(3)]
        return jnp.stack(cols, axis=0)

    # stacked matmul operand: [cond taps; x_start taps; noise taps; batch one-hot]
    a = jnp.concatenate(
        [im2col3x3_T(x_interp), im2col3x3_T(x_hr), im2col3x3_T(noise), onehot.T],
        axis=0).astype(jnp.float32)                                         # (K, M)

    # fused layer-1 weights: [w1_cond | w1_xnoisy | w1_xnoisy | (b1 + temb)_b]
    temb = timestep_embedding(t, params["temb_dim"])
    temb = (temb @ params["w_temb"] + params["b_temb"]).astype(jnp.float32)  # (B, hidden)
    w1 = params["w1"]                                                        # (3,3,2,hidden)
    w1c = w1[:, :, 0, :].reshape(N_TAPS, hidden)
    w1x = w1[:, :, 1, :].reshape(N_TAPS, hidden)
    bias_eff = params["b1"][None, :] + temb                                  # (B, hidden)
    w1_full = jnp.concatenate([w1c, w1x, w1x, bias_eff], axis=0).T           # (hidden, K)
    K = w1_full.shape[1]                                                     # 27 + B

    w2 = params["w2"].reshape(1, hidden).astype(jnp.float32)
    b2 = params["b2"].reshape(1).astype(jnp.float32)

    # One grid step covers the whole problem at these shapes; keep M as a
    # reduction grid axis so larger H,W / B just tile (and VMEM stays bounded
    # on v7x's 64 MiB).
    m_tile = M if M <= 4096 else 4096
    assert M % m_tile == 0 and (m_tile == M or m_tile % 128 == 0)
    grid = (M // m_tile,)

    loss2d = pl.pallas_call(
        ddpm_p_losses_kernel,
        out_shape=jax.ShapeDtypeStruct((1, B), jnp.float32),
        grid=grid,
        in_specs=[
            pl.BlockSpec(memory_space=pltpu.MemorySpace.SMEM),   # b2
            pl.BlockSpec((K, m_tile), lambda i: (0, i)),         # stacked taps
            pl.BlockSpec((1, m_tile), lambda i: (0, i)),         # sqrt_ac[t]
            pl.BlockSpec((1, m_tile), lambda i: (0, i)),         # sqrt_1m_ac[t]
            pl.BlockSpec((hidden, K), lambda i: (0, 0)),         # fused w1
            pl.BlockSpec((1, hidden), lambda i: (0, 0)),         # w2
            pl.BlockSpec((m_tile, B), lambda i: (i, 0)),         # segment matrix
        ],
        out_specs=pl.BlockSpec((1, B), lambda i: (0, 0)),
        compiler_params=pltpu.CompilerParams(
            # the M axis is a reduction into the (1, B) loss accumulator
            dimension_semantics=("arbitrary",)),
    )(b2, a, sa_row, soma_row, w1_full, w2, seg)
    return loss2d[0]


# ----------------------------- pure-JAX reference ----------------------------
def ddpm_forward_reference(x_hr, x_interp, t, noise, params, sched,
                           l_simple_weight=1.0, original_elbo_weight=0.0):
    sqrt_ac, sqrt_1m_ac, lvlb = sched
    hidden = params["w1"].shape[-1]
    sa = sqrt_ac[t][:, None, None, None]
    soma = sqrt_1m_ac[t][:, None, None, None]
    x_noisy = sa * x_hr + soma * noise
    inp = jnp.concatenate([x_interp, x_noisy], axis=1)          # [B,2,H,W]
    out1 = jax.lax.conv_general_dilated(
        inp, params["w1"], (1, 1), "SAME",
        dimension_numbers=("NCHW", "HWIO", "NCHW"))
    temb = timestep_embedding(t, params["temb_dim"]) @ params["w_temb"] + params["b_temb"]
    h = jax.nn.relu(out1 + params["b1"][None, :, None, None] + temb[:, :, None, None])
    out = jax.lax.conv_general_dilated(
        h, params["w2"].reshape(1, 1, hidden, 1), (1, 1), "SAME",
        dimension_numbers=("NCHW", "HWIO", "NCHW")) + params["b2"]
    loss = jnp.mean((out - noise) ** 2, axis=(1, 2, 3))
    wfac = l_simple_weight + original_elbo_weight * lvlb[t]
    return loss * wfac


# ----------------------------- main -------------------------------------------
if __name__ == "__main__":
    B, H, W = 2, 16, 16
    hidden, temb_dim = 32, 32
    timesteps = 100

    key = jax.random.PRNGKey(0)
    ks = jax.random.split(key, 10)

    # inputs (the forward() dict: HR, INTERPOLATED), noise and random timesteps
    x_hr = jax.random.normal(ks[0], (B, 1, H, W), jnp.float32)
    x_interp = jax.random.normal(ks[1], (B, 1, H, W), jnp.float32)
    noise = jax.random.normal(ks[2], (B, 1, H, W), jnp.float32)
    t = jax.random.randint(ks[3], (B,), 0, timesteps)

    # deterministic synthetic denoise_net parameters
    params = {
        "w1": 0.1 * jax.random.normal(ks[4], (3, 3, 2, hidden), jnp.float32),
        "b1": 0.05 * jax.random.normal(ks[5], (hidden,), jnp.float32),
        "w2": 0.1 * jax.random.normal(ks[6], (hidden,), jnp.float32),
        "b2": jnp.asarray(0.01, jnp.float32),
        "w_temb": 0.1 * jax.random.normal(ks[7], (temb_dim, hidden), jnp.float32),
        "b_temb": jnp.zeros((hidden,), jnp.float32),
        "temb_dim": temb_dim,
    }

    sched = ddpm_schedule(timesteps)

    loss = ddpm_forward(x_hr, x_interp, t, noise, params, sched)
    jax.block_until_ready(loss)

    ref = ddpm_forward_reference(x_hr, x_interp, t, noise, params, sched)
    np.testing.assert_allclose(np.asarray(loss), np.asarray(ref), rtol=1e-2, atol=1e-3)

    print("KERNEL_OK")
</pallas_src>

<mosaic_0001>
module attributes {stable_mosaic.version = 11 : i64} {
  func.func @ddpm_p_losses_kernel(%arg0: i32, %arg1: memref<1xf32, #tpu.memory_space<smem>>, %arg2: memref<29x512xf32, #tpu.memory_space<vmem>>, %arg3: memref<1x512xf32, #tpu.memory_space<vmem>>, %arg4: memref<1x512xf32, #tpu.memory_space<vmem>>, %arg5: memref<32x29xf32, #tpu.memory_space<vmem>>, %arg6: memref<1x32xf32, #tpu.memory_space<vmem>>, %arg7: memref<512x2xf32, #tpu.memory_space<vmem>>, %arg8: memref<1x2xf32, #tpu.memory_space<vmem>>) attributes {dimension_semantics = [#tpu.dimension_semantics<arbitrary>], iteration_bounds = array<i64: 1>, scalar_prefetch = 0 : i64, scratch_operands = 0 : i64, tpu.core_type = #tpu.core_type<tc>, window_params = [{transform_indices = @transform_0, window_bounds = array<i64: 1>}, {transform_indices = @transform_1, window_bounds = array<i64: 29, 512>}, {transform_indices = @transform_2, window_bounds = array<i64: 1, 512>}, {transform_indices = @transform_3, window_bounds = array<i64: 1, 512>}, {pipeline_mode = #tpu.pipeline_mode<synchronous>, transform_indices = @transform_4, window_bounds = array<i64: 32, 29>}, {pipeline_mode = #tpu.pipeline_mode<synchronous>, transform_indices = @transform_5, window_bounds = array<i64: 1, 32>}, {transform_indices = @transform_6, window_bounds = array<i64: 512, 2>}, {pipeline_mode = #tpu.pipeline_mode<synchronous>, transform_indices = @transform_7, window_bounds = array<i64: 1, 2>}]} {
    %c0_i32 = arith.constant 0 : i32
    %0 = arith.cmpi eq, %arg0, %c0_i32 : i32
    %1 = arith.extui %0 : i1 to i32
    %c0_i32_0 = arith.constant 0 : i32
    %2 = arith.cmpi ne, %1, %c0_i32_0 : i32
    scf.if %2 {
      %cst_21 = arith.constant 0.000000e+00 : f32
      %39 = vector.broadcast %cst_21 : f32 to vector<1x2xf32>
      %c0_22 = arith.constant 0 : index
      %c0_23 = arith.constant 0 : index
      %40 = vector.load %arg8[%c0_22, %c0_23] : memref<1x2xf32, #tpu.memory_space<vmem>>, vector<1x2xf32>
      tpu.vector_store %arg8[%c0_22, %c0_23], %39 {strides = array<i32>} : memref<1x2xf32, #tpu.memory_space<vmem>>, vector<1x2xf32>,
    } else {
    }
    %c0 = arith.constant 0 : index
    %c0_1 = arith.constant 0 : index
    %3 = vector.load %arg2[%c0, %c0_1] : memref<29x512xf32, #tpu.memory_space<vmem>>, vector<29x512xf32>
    %4 = tpu.iota {dimensions = array<i32: 0>} : vector<29x512xi32>
    %c9_i32 = arith.constant 9 : i32
    %5 = vector.broadcast %c9_i32 : i32 to vector<29x512xi32>
    %6 = arith.cmpi slt, %4, %5 : vector<29x512xi32>
    %c27_i32 = arith.constant 27 : i32
    %7 = vector.broadcast %c27_i32 : i32 to vector<29x512xi32>
    %8 = arith.cmpi sge, %4, %7 : vector<29x512xi32>
    %9 = arith.ori %6, %8 : vector<29x512xi1>
    %c18_i32 = arith.constant 18 : i32
    %10 = vector.broadcast %c18_i32 : i32 to vector<29x512xi32>
    %11 = arith.cmpi slt, %4, %10 : vector<29x512xi32>
    %c0_2 = arith.constant 0 : index
    %c0_3 = arith.constant 0 : index
    %12 = vector.load %arg3[%c0_2, %c0_3] : memref<1x512xf32, #tpu.memory_space<vmem>>, vector<1x512xf32>
    %c0_4 = arith.constant 0 : index
    %c0_5 = arith.constant 0 : index
    %13 = vector.load %arg4[%c0_4, %c0_5] : memref<1x512xf32, #tpu.memory_space<vmem>>, vector<1x512xf32>
    %14 = vector.shape_cast %12 : vector<1x512xf32> to vector<1x512xf32>
    %15 = vector.broadcast %14 : vector<1x512xf32> to vector<29x512xf32>
    %16 = vector.shape_cast %13 : vector<1x512xf32> to vector<1x512xf32>
    %17 = vector.broadcast %16 : vector<1x512xf32> to vector<29x512xf32>
    %18 = arith.select %11, %15, %17 : vector<29x512xi1>, vector<29x512xf32>
    %cst = arith.constant 1.000000e+00 : f32
    %19 = vector.broadcast %cst : f32 to vector<29x512xf32>
    %20 = arith.select %9, %19, %18 : vector<29x512xi1>, vector<29x512xf32>
    %21 = arith.mulf %3, %20 : vector<29x512xf32>
    %c0_6 = arith.constant 0 : index
    %c0_7 = arith.constant 0 : index
    %22 = vector.load %arg5[%c0_6, %c0_7] : memref<32x29xf32, #tpu.memory_space<vmem>>, vector<32x29xf32>
    %cst_8 = arith.constant dense<0.000000e+00> : vector<32x512xf32>
    %23 = tpu.matmul %22, %21, %cst_8 {dimension_numbers = #tpu.dot_dimension_numbers<[1], [0], [0], [1], [0, 0, 1, 1], [], []>} : vector<32x29xf32>, vector<29x512xf32>, vector<32x512xf32> -> vector<32x512xf32>
    %cst_9 = arith.constant 0.000000e+00 : f32
    %24 = vector.broadcast %cst_9 : f32 to vector<32x512xf32>
    %25 = arith.maximumf %23, %24 : vector<32x512xf32>
    %c0_10 = arith.constant 0 : index
    %c0_11 = arith.constant 0 : index
    %26 = vector.load %arg6[%c0_10, %c0_11] : memref<1x32xf32, #tpu.memory_space<vmem>>, vector<1x32xf32>
    %cst_12 = arith.constant dense<0.000000e+00> : vector<1x512xf32>
    %27 = tpu.matmul %26, %25, %cst_12 {dimension_numbers = #tpu.dot_dimension_numbers<[1], [0], [0], [1], [0, 0, 1, 1], [], []>} : vector<1x32xf32>, vector<32x512xf32>, vector<1x512xf32> -> vector<1x512xf32>
    %c0_13 = arith.constant 0 : index
    %28 = memref.load %arg1[%c0_13] : memref<1xf32, #tpu.memory_space<smem>>
    %29 = vector.broadcast %28 : f32 to vector<1x512xf32>
    %30 = arith.addf %27, %29 : vector<1x512xf32>
    %31 = vector.extract_strided_slice %3 {offsets = [22, 0], sizes = [1, 512], strides = [1, 1]} : vector<29x512xf32> to vector<1x512xf32>
    %32 = arith.subf %30, %31 : vector<1x512xf32>
    %c0_14 = arith.constant 0 : index
    %c0_15 = arith.constant 0 : index
    %33 = vector.load %arg8[%c0_14, %c0_15] : memref<1x2xf32, #tpu.memory_space<vmem>>, vector<1x2xf32>
    %34 = arith.mulf %32, %32 : vector<1x512xf32>
    %c0_16 = arith.constant 0 : index
    %c0_17 = arith.constant 0 : index
    %35 = vector.load %arg7[%c0_16, %c0_17] : memref<512x2xf32, #tpu.memory_space<vmem>>, vector<512x2xf32>
    %cst_18 = arith.constant dense<0.000000e+00> : vector<1x2xf32>
    %36 = tpu.matmul %34, %35, %cst_18 {dimension_numbers = #tpu.dot_dimension_numbers<[1], [0], [0], [1], [0, 0, 1, 1], [], []>} : vector<1x512xf32>, vector<512x2xf32>, vector<1x2xf32> -> vector<1x2xf32>
    %37 = arith.addf %33, %36 : vector<1x2xf32>
    %c0_19 = arith.constant 0 : index
    %c0_20 = arith.constant 0 : index
    %38 = vector.load %arg8[%c0_19, %c0_20] : memref<1x2xf32, #tpu.memory_space<vmem>>, vector<1x2xf32>
    tpu.vector_store %arg8[%c0_19, %c0_20], %37 {strides = array<i32>} : memref<1x2xf32, #tpu.memory_space<vmem>>, vector<1x2xf32>,
    return
  }
  func.func @transform_0(%arg0: i32) -> i32 {
    %c0_i32 = arith.constant 0 : i32
    %c0_i32_0 = arith.constant 0 : i32
    return %c0_i32 : i32
  }
  func.func @transform_1(%arg0: i32) -> (i32, i32) {
    %c0_i32 = arith.constant 0 : i32
    %c0_i32_0 = arith.constant 0 : i32
    return %c0_i32, %arg0 : i32, i32
  }
  func.func @transform_2(%arg0: i32) -> (i32, i32) {
    %c0_i32 = arith.constant 0 : i32
    %c0_i32_0 = arith.constant 0 : i32
    return %c0_i32, %arg0 : i32, i32
  }
  func.func @transform_3(%arg0: i32) -> (i32, i32) {
    %c0_i32 = arith.constant 0 : i32
    %c0_i32_0 = arith.constant 0 : i32
    return %c0_i32, %arg0 : i32, i32
  }
  func.func @transform_4(%arg0: i32) -> (i32, i32) {
    %c0_i32 = arith.constant 0 : i32
    %c0_i32_0 = arith.constant 0 : i32
    %c0_i32_1 = arith.constant 0 : i32
    return %c0_i32, %c0_i32_0 : i32, i32
  }
  func.func @transform_5(%arg0: i32) -> (i32, i32) {
    %c0_i32 = arith.constant 0 : i32
    %c0_i32_0 = arith.constant 0 : i32
    %c0_i32_1 = arith.constant 0 : i32
    return %c0_i32, %c0_i32_0 : i32, i32
  }
  func.func @transform_6(%arg0: i32) -> (i32, i32) {
    %c0_i32 = arith.constant 0 : i32
    %c0_i32_0 = arith.constant 0 : i32
    return %arg0, %c0_i32 : i32, i32
  }
  func.func @transform_7(%arg0: i32) -> (i32, i32) {
    %c0_i32 = arith.constant 0 : i32
    %c0_i32_0 = arith.constant 0 : i32
    %c0_i32_1 = arith.constant 0 : i32
    return %c0_i32, %c0_i32_0 : i32, i32
  }
}

</mosaic_0001>

<bundles_post_ra>
// kernel: tpu_custom_call.1
= control target key start
LH: loop header
LB: loop body
LE: loop exit
PB: predicated region body
PF: predicated region fallthrough
CT: control target
= control target key end

     0   :  { %v50_v0 = vlaneseq  ;;  %v989_v2 = vmov 0.0   ;;  %vm180_vm0 = vcmask 1044480   ;;  %s1384_s0 = inlined_call_operand.<no memory space> [shape: f32[1], index: 0, kind: input, shape index: {}]   ;;  %s1385_s1 = inlined_call_operand.vmem [shape: f32[29,512], index: 1, kind: input, shape index: {}]   ;;  %s1386_s2 = inlined_call_operand.vmem [shape: f32[1,512], index: 2, kind: input, shape index: {}]   ;;  %s1387_s3 = inlined_call_operand.vmem [shape: f32[1,512], index: 3, kind: input, shape index: {}]   ;;  %s1388_s4 = inlined_call_operand.vmem [shape: f32[32,29], index: 4, kind: input, shape index: {}]   ;;  %s1389_s5 = inlined_call_operand.vmem [shape: f32[1,32], index: 5, kind: input, shape index: {}]   ;;  %s1390_s6 = inlined_call_operand.vmem [shape: f32[512,2], index: 6, kind: input, shape index: {}]   ;;  %s1391_s7 = inlined_call_operand.hbm [shape: f32[1,2], index: 7, kind: output, shape index: {}]  }
   0x1   :  { %257 = vmatprep.mubr.f32.mxu0 %v989_v2  ;;  %346 = vmatprep.mubr.f32.mxu1 %v989_v2  ;;  %v71_v3 = vld [vmem:[%s1386_s2] sm:$0xf]  ;;  %v39_v12 = vld [vmem:[%s1385_s1 + $0x28] sm:$0xff]  ;;  %v41_v16 = vld [vmem:[%s1385_s1 + $0x38] sm:$0xff] }
   0x2   :  { %v51_v1 = vshrl.u32 %v50_v0, 7  ;;  %v72_v4 = vld [vmem:[%s1387_s3] sm:$0xf]  ;;  %v35_v15 = vld [vmem:[%s1385_s1 + $0x8] sm:$0xff]  ;;  %v40_v24 = vld [vmem:[%s1385_s1 + $0x30] sm:$0xff] }
   0x3   :  { %v38_v19 = vld [vmem:[%s1385_s1 + $0x20] sm:$0xff]  ;;  %v1066_v27 = vld [vmem:[%s1385_s1 + $0x48] sm:$0xff] }
   0x4   :  { %v52_v5 = vadd.s32 8, %v51_v1  ;;  %v1040_v6 = vadd.s32 16, %v51_v1  ;;  %v80_v7 = vsub.s32 1, %v51_v1  ;;  %v88_v8 = vsub.s32 3, %v51_v1 }
   0x5   :  { %v76_v9 = vsub.s32 0, %v51_v1  ;;  %v84_v10 = vsub.s32 2, %v51_v1  ;;  %v1042_v11 = vadd.s32 24, %v51_v1 }
   0x6   :  { %vm56_vm1 = vcmp.lt.s32.totalorder %v52_v5, 9  ;;  %vm69_vm2 = vcmp.lt.s32.totalorder %v1040_v6, 18  ;;  %v81_v13 = vrot.slane %v71_v3, %v80_v7  ;;  %v102_v14 = vrot.slane %v72_v4, %v80_v7 }
   0x7   :  { %v89_v17 = vrot.slane %v71_v3, %v88_v8  ;;  %v110_v18 = vrot.slane %v72_v4, %v88_v8  ;;  %v77_v20 = vrot.slane %v71_v3, %v76_v9  ;;  %v98_v21 = vrot.slane %v72_v4, %v76_v9 }
   0x8   :  { %v124_v22 = vsel %vm69_vm2, %v81_v13, %v102_v14  ;;  %v136_v23 = vsel %vm56_vm1, 1.0, %v81_v13  ;;  %v85_v25 = vrot.slane %v71_v3, %v84_v10  ;;  %v106_v26 = vrot.slane %v72_v4, %v84_v10 }
   0x9   :  { %13 = vsyncpa [#allocation4], 0  ;;  %v152_v28 = vmul.f32 %v136_v23, %v39_v12  ;;  %v37_v29 = vld [vmem:[%s1385_s1 + $0x18] sm:$0xff]  ;;  %v126_v30 = vsel %vm69_vm2, %v89_v17, %v110_v18  ;;  %v138_v31 = vsel %vm56_vm1, 1.0, %v89_v17  ;;  %v34_v32 = vld [vmem:[%s1385_s1] sm:$0xff]  ;;  %v135_v33 = vsel %vm56_vm1, 1.0, %v77_v20 }
   0xa   :  { %v47_v34 = vld [vmem:[%s1385_s1 + $0x68] sm:$0x1f]  ;;  %v154_v35 = vmul.f32 %v138_v31, %v41_v16  ;;  %v151_v36 = vmul.f32 %v135_v33, %v38_v19  ;;  %v36_v37 = vld [vmem:[%s1385_s1 + $0x10] sm:$0xff]  ;;  %v137_v38 = vsel %vm56_vm1, 1.0, %v85_v25  ;;  %vm62_vm3 = vcmp.ge.s32.totalorder %v1042_v11, 27  ;;  %v1089_v39 = vld [vmem:[%s1385_s1 + $0x58] sm:$0xff] }
   0xb   :  { %v49_v40 = vld [vmem:[%s1385_s1 + $0x78] sm:$0x1f]  ;;  %v862_v41 = vpack.c.bf16 %v152_v28, %v35_v15  ;;  %v153_v42 = vmul.f32 %v137_v38, %v40_v24  ;;  %v144_v43 = vsel %vm62_vm3, 1.0, %v102_v14  ;;  %v156_v44 = vmul.f32 %v124_v22, %v1066_v27  ;;  %v1100_v45 = vld [vmem:[%s1385_s1 + $0x40] sm:$0xff]  ;;  %v1110_v51 = vld [vmem:[%s1385_s1 + $0x50] sm:$0xff] }
   0xc   :  { %v872_v46 = vpack.c.bf16 %v154_v35, %v37_v29  ;;  %v864_v47 = vpack.c.bf16 %v151_v36, %v34_v32  ;;  %v160_v48 = vmul.f32 %v144_v43, %v47_v34  ;;  %v146_v49 = vsel %vm62_vm3, 1.0, %v110_v18  ;;  %v46_v50 = vld [vmem:[%s1385_s1 + $0x60] sm:$0x1f]  ;;  %v48_v57 = vld [vmem:[%s1385_s1 + $0x70] sm:$0x1f]  ;;  %v164_v7 = vld [vmem:[%s1388_s4 + $0x8] sm:$0xff] }
   0xd   :  { %863 = vmatprep.subr.bf16.mxu0 %v862_v41  ;;  %v874_v52 = vpack.c.bf16 %v153_v42, %v36_v37  ;;  %vm990_vm4 = vmmov 1   ;;  %v158_v54 = vmul.f32 %v126_v30, %v1089_v39  ;;  %v162_v55 = vmul.f32 %v146_v49, %v49_v40  ;;  %v163_v6 = vld [vmem:[%s1388_s4] sm:$0xff]  ;;  %v165_v8 = vld [vmem:[%s1388_s4 + $0x10] sm:$0xff]  ;;  %v166_v9 = vld [vmem:[%s1388_s4 + $0x18] sm:$0xff] }
   0xe   :  { %vm1113_vm5 = vmpackc.low %vm180_vm0, %vm990_vm4  ;;  %v123_v56 = vsel %vm69_vm2, %v77_v20, %v98_v21  ;;  %873 = vmatprep.subr.bf16.mxu1 %v872_v46  ;;  %865 = vmatpush1.bf16.msra.mxu0 %v864_v47  ;;  %v866_v58 = vpack.c.bf16 %v160_v48, %v156_v44  ;;  %v143_v59 = vsel %vm62_vm3, 1.0, %v98_v21  ;;  %v125_v61 = vsel %vm69_vm2, %v85_v25, %v106_v26  ;;  %v573_v36 = vld [vmem:[%s1390_s6 + $0x80] sm:$0xff]  ;;  %v574_v42 = vld [vmem:[%s1390_s6 + $0x88] sm:$0xff] }
   0xf   :  { %v155_v60 = vmul.f32 %v123_v56, %v1100_v45  ;;  %875 = vmatpush1.bf16.msra.mxu1 %v874_v52  ;;  %v876_v62 = vpack.c.bf16 %v162_v55, %v158_v54  ;;  %v159_v63 = vmul.f32 %v143_v59, %v46_v50  ;;  %v145_v0 = vsel %vm62_vm3, 1.0, %v106_v26  ;;  %v605_v43 = vld [vmem:[%s1390_s6 + $0x180] sm:$0xff]  ;;  %v606_v50 = vld [vmem:[%s1390_s6 + $0x188] sm:$0xff] }
  0x10   :  { %v157_v1 = vmul.f32 %v125_v61, %v1110_v51  ;;  %868 = vmatprep.subr.msk.bf16.mxu0 %vm1113_vm5, %v866_v58  ;;  %v161_v3 = vmul.f32 %v145_v0, %v48_v57  ;;  %vm167_vm6 = vcmask 236544   ;;  %v898_v57 = vpack.c.bf16 %v574_v42, %v573_v36  ;;  %v557_v58 = vld [vmem:[%s1390_s6] sm:$0xff]  ;;  %v558_v59 = vld [vmem:[%s1390_s6 + $0x8] sm:$0xff]  ;;  %v575_v0 = vld [vmem:[%s1390_s6 + $0x90] sm:$0xff] }
  0x11   :  { %878 = vmatprep.subr.msk.bf16.mxu1 %vm1113_vm5, %v876_v62  ;;  %v869_v4 = vpack.c.bf16 %v159_v63, %v155_v60  ;;  %v589_v60 = vld [vmem:[%s1390_s6 + $0x100] sm:$0xff]  ;;  %v930_v62 = vpack.c.bf16 %v606_v50, %v605_v43  ;;  %v590_v63 = vld [vmem:[%s1390_s6 + $0x108] sm:$0xff]  ;;  %vm390_vm7 = vcmask 261120   ;;  %v595_v36 = vld [vmem:[%s1390_s6 + $0x130] sm:$0xff]  ;;  %vm32_vm8 = vcmask 8192  }
  0x12   :  { %v879_v5 = vpack.c.bf16 %v161_v3, %v157_v1  ;;  %v576_v1 = vld [vmem:[%s1390_s6 + $0x98] sm:$0xff]  ;;  %v607_v3 = vld [vmem:[%s1390_s6 + $0x190] sm:$0xff]  ;;  %v613_v42 = vld [vmem:[%s1390_s6 + $0x1c0] sm:$0xff]  ;;  %33 = vst.msk [vmem:[#allocation3] sm:$0x1] %vm32_vm8, %v989_v2 }
  0x13   :  { %871 = vmatpush1.bf16.msk.msra.mxu0 %vm1113_vm5, %v869_v4  ;;  %v608_v4 = vld [vmem:[%s1390_s6 + $0x198] sm:$0xff]  ;;  %v614_v43 = vld [vmem:[%s1390_s6 + $0x1c8] sm:$0xff]  ;;  %v597_v50 = vld [vmem:[%s1390_s6 + $0x140] sm:$0xff] }
  0x14   :  { %881 = vmatpush1.bf16.msk.msra.mxu1 %vm1113_vm5, %v879_v5  ;;  %v387_v5 = vld [vmem:[%s1389_s5] sm:$0x1] }
  0x16   :  { %780 = vmatmul.mubr.msk.f32.vlgmr.msra.gmra.mrb[0].mxu0 %vm167_vm6, %v163_v6 }
  0x17   :  { %786 = vmatmul.mubr.msk.f32.vlgmr.msra.gmra.mrb[0].mxu1 %vm167_vm6, %v163_v6  ;;  %263 = vmatprep.mubr.f32.mxu0 %v989_v2  ;;  %v900_v6 = vpack.c.bf16 %v558_v59, %v557_v58 }
  0x18   :  { %352 = vmatprep.mubr.f32.mxu1 %v989_v2 }
  0x1a   :  { %781 = vmatmul.mubr.msk.f32.gmra.mrb[2].mxu0 %vm167_vm6, %v164_v7 }
  0x1b   :  { %787 = vmatmul.mubr.msk.f32.gmra.mrb[2].mxu1 %vm167_vm6, %v164_v7  ;;  %269 = vmatprep.mubr.f32.mxu0 %v989_v2  ;;  %v932_v7 = vpack.c.bf16 %v590_v63, %v589_v60 }
  0x1c   :  { %358 = vmatprep.mubr.f32.mxu1 %v989_v2 }
  0x1e   :  { %782 = vmatmul.mubr.msk.f32.gmra.mrb[4].mxu0 %vm167_vm6, %v165_v8 }
  0x1f   :  { %788 = vmatmul.mubr.msk.f32.gmra.mrb[4].mxu1 %vm167_vm6, %v165_v8  ;;  %275 = vmatprep.mubr.f32.mxu0 %v989_v2  ;;  %v902_v8 = vpack.c.bf16 %v576_v1, %v575_v0  ;;  %v599_v0 = vld [vmem:[%s1390_s6 + $0x150] sm:$0xff]  ;;  %v600_v1 = vld [vmem:[%s1390_s6 + $0x158] sm:$0xff] }
  0x20   :  { %364 = vmatprep.mubr.f32.mxu1 %v989_v2 }
  0x22   :  { %783 = vmatmul.mubr.msk.f32.gmra.mrb[6].mxu0 %vm167_vm6, %v166_v9 }
  0x23   :  { %789 = vmatmul.mubr.msk.f32.gmra.mrb[6].mxu1 %vm167_vm6, %v166_v9  ;;  %458 = vmatprep.mubr.f32.mxu0 %v989_v2  ;;  %v559_v9 = vld [vmem:[%s1390_s6 + $0x10] sm:$0xff] }
  0x24   :  { %529 = vmatprep.mubr.f32.mxu1 %v989_v2 }
  0xe9   :  { %v259_v10 = vpop.f32.mrb[0].mxu0 }
  0xea   :  { %v348_v11 = vpop.f32.mrb[0].mxu1  ;;  %v261_v12 = vpop.f32.mrb[1].mxu0  ;;  %v371_v15 = vmax.f32 %v259_v10, 0.0  ;;  %v560_v10 = vld [vmem:[%s1390_s6 + $0x18] sm:$0xff] }
  0xeb   :  { %v350_v13 = vpop.f32.mrb[1].mxu1  ;;  %v373_v19 = vmax.f32 %v348_v11, 0.0  ;;  %v372_v20 = vmax.f32 %v261_v12, 0.0  ;;  %v591_v11 = vld [vmem:[%s1390_s6 + $0x110] sm:$0xff]  ;;  %v934_v12 = vpack.c.bf16 %v608_v4, %v607_v3  ;;  %v952_v4 = vpack.c.bf16 %v600_v1, %v599_v0 }
  0xec   :  { %v374_v24 = vmax.f32 %v350_v13, 0.0  ;;  %v592_v13 = vld [vmem:[%s1390_s6 + $0x118] sm:$0xff] }
  0xed   :  { %v265_v14 = vpop.f32.mrb[2].mxu0 }
  0xee   :  { %v375_v16 = vmax.f32 %v265_v14, 0.0  ;;  %v354_v17 = vpop.f32.mrb[2].mxu1  ;;  %v267_v18 = vpop.f32.mrb[3].mxu0  ;;  %v577_v14 = vld [vmem:[%s1390_s6 + $0xa0] sm:$0xff] }
  0xef   :  { %v377_v21 = vmax.f32 %v354_v17, 0.0  ;;  %v376_v22 = vmax.f32 %v267_v18, 0.0  ;;  %v356_v23 = vpop.f32.mrb[3].mxu1  ;;  %v610_v17 = vld [vmem:[%s1390_s6 + $0x1a8] sm:$0xff]  ;;  %v904_v18 = vpack.c.bf16 %v560_v10, %v559_v9  ;;  %v569_v10 = vld [vmem:[%s1390_s6 + $0x60] sm:$0xff] }
  0xf0   :  { %v884_v25 = vpack.c.bf16 %v375_v16, %v371_v15  ;;  %v378_v26 = vmax.f32 %v356_v23, 0.0  ;;  %v578_v15 = vld [vmem:[%s1390_s6 + $0xa8] sm:$0xff]  ;;  %v609_v16 = vld [vmem:[%s1390_s6 + $0x1a0] sm:$0xff] }
  0xf1   :  { %v892_v28 = vpack.c.bf16 %v377_v21, %v373_v19  ;;  %v882_v29 = vpack.c.bf16 %v376_v22, %v372_v20  ;;  %v271_v30 = vpop.f32.mrb[4].mxu0  ;;  %v936_v19 = vpack.c.bf16 %v592_v13, %v591_v11  ;;  %v906_v20 = vpack.c.bf16 %v578_v15, %v577_v14  ;;  %v561_v21 = vld [vmem:[%s1390_s6 + $0x20] sm:$0xff]  ;;  %v562_v22 = vld [vmem:[%s1390_s6 + $0x28] sm:$0xff] }
  0xf2   :  { %v890_v31 = vpack.c.bf16 %v378_v26, %v374_v24  ;;  %v360_v32 = vpop.f32.mrb[4].mxu1  ;;  %v273_v33 = vpop.f32.mrb[5].mxu0  ;;  %v379_v37 = vmax.f32 %v271_v30, 0.0  ;;  %v593_v23 = vld [vmem:[%s1390_s6 + $0x120] sm:$0xff]  ;;  %v938_v24 = vpack.c.bf16 %v610_v17, %v609_v16  ;;  %v579_v26 = vld [vmem:[%s1390_s6 + $0xb0] sm:$0xff]  ;;  %v612_v30 = vld [vmem:[%s1390_s6 + $0x1b8] sm:$0xff] }
  0xf3   :  { %v362_v34 = vpop.f32.mrb[5].mxu1  ;;  %883 = vmatprep.subr.bf16.mxu0 %v882_v29  ;;  %v381_v44 = vmax.f32 %v360_v32, 0.0  ;;  %v380_v46 = vmax.f32 %v273_v33, 0.0  ;;  %v611_v29 = vld [vmem:[%s1390_s6 + $0x1b0] sm:$0xff]  ;;  %v618_v9 = vld [vmem:[%s1390_s6 + $0x1e8] sm:$0xff]  ;;  %v601_v14 = vld [vmem:[%s1390_s6 + $0x160] sm:$0xff] }
  0xf4   :  { %891 = vmatprep.subr.bf16.mxu1 %v890_v31  ;;  %885 = vmatpush1.bf16.msra.mxu0 %v884_v25  ;;  %v382_v52 = vmax.f32 %v362_v34, 0.0  ;;  %v594_v25 = vld [vmem:[%s1390_s6 + $0x128] sm:$0xff]  ;;  %v908_v31 = vpack.c.bf16 %v562_v22, %v561_v21  ;;  %v563_v34 = vld [vmem:[%s1390_s6 + $0x30] sm:$0xff]  ;;  %v620_v21 = vld [vmem:[%s1390_s6 + $0x1f8] sm:$0xff] }
  0xf5   :  { %893 = vmatpush1.bf16.msra.mxu1 %v892_v28  ;;  %v277_v35 = vpop.f32.mrb[6].mxu0  ;;  %v580_v28 = vld [vmem:[%s1390_s6 + $0xb8] sm:$0xff]  ;;  %v940_v32 = vpack.c.bf16 %v594_v25, %v593_v23  ;;  %v570_v11 = vld [vmem:[%s1390_s6 + $0x68] sm:$0xff]  ;;  %v587_v17 = vld [vmem:[%s1390_s6 + $0xf0] sm:$0xff] }
  0xf6   :  { %v383_v38 = vmax.f32 %v277_v35, 0.0  ;;  %v366_v40 = vpop.f32.mrb[6].mxu1  ;;  %v279_v41 = vpop.f32.mrb[7].mxu0  ;;  %v910_v33 = vpack.c.bf16 %v580_v28, %v579_v26  ;;  %v564_v35 = vld [vmem:[%s1390_s6 + $0x38] sm:$0xff]  ;;  %v924_v13 = vpack.c.bf16 %v570_v11, %v569_v10  ;;  %v602_v15 = vld [vmem:[%s1390_s6 + $0x168] sm:$0xff]  ;;  %v571_v22 = vld [vmem:[%s1390_s6 + $0x70] sm:$0xff] }
  0xf7   :  { %v385_v47 = vmax.f32 %v366_v40, 0.0  ;;  %v384_v48 = vmax.f32 %v279_v41, 0.0  ;;  %v368_v49 = vpop.f32.mrb[7].mxu1  ;;  %v581_v40 = vld [vmem:[%s1390_s6 + $0xc0] sm:$0xff]  ;;  %v582_v41 = vld [vmem:[%s1390_s6 + $0xc8] sm:$0xff]  ;;  %v956_v16 = vpack.c.bf16 %v602_v15, %v601_v14  ;;  %v572_v23 = vld [vmem:[%s1390_s6 + $0x78] sm:$0xff] }
  0xf8   :  { %v888_v53 = vpack.c.bf16 %v383_v38, %v379_v37  ;;  %v386_v54 = vmax.f32 %v368_v49, 0.0  ;;  %v942_v37 = vpack.c.bf16 %v612_v30, %v611_v29  ;;  %v596_v38 = vld [vmem:[%s1390_s6 + $0x138] sm:$0xff]  ;;  %v566_v49 = vld [vmem:[%s1390_s6 + $0x48] sm:$0xff]  ;;  %v928_v25 = vpack.c.bf16 %v572_v23, %v571_v22  ;;  %v603_v26 = vld [vmem:[%s1390_s6 + $0x170] sm:$0xff] }
  0xf9   :  { %v896_v55 = vpack.c.bf16 %v385_v47, %v381_v44  ;;  %v886_v56 = vpack.c.bf16 %v384_v48, %v380_v46  ;;  %v912_v44 = vpack.c.bf16 %v564_v35, %v563_v34  ;;  %v944_v46 = vpack.c.bf16 %v596_v38, %v595_v36  ;;  %v565_v48 = vld [vmem:[%s1390_s6 + $0x40] sm:$0xff]  ;;  %v604_v28 = vld [vmem:[%s1390_s6 + $0x178] sm:$0xff] }
  0xfa   :  { %v894_v61 = vpack.c.bf16 %v386_v54, %v382_v52  ;;  %v914_v47 = vpack.c.bf16 %v582_v41, %v581_v40  ;;  %v946_v52 = vpack.c.bf16 %v614_v43, %v613_v42  ;;  %v583_v54 = vld [vmem:[%s1390_s6 + $0xd0] sm:$0xff]  ;;  %v916_v58 = vpack.c.bf16 %v566_v49, %v565_v48 }
  0xfb   :  { %887 = vmatprep.subr.bf16.mxu0 %v886_v56  ;;  %v615_v56 = vld [vmem:[%s1390_s6 + $0x1d0] sm:$0xff]  ;;  %v960_v29 = vpack.c.bf16 %v604_v28, %v603_v26  ;;  %v389_v30 = vstv %s1384_s0  ;;  %v541_v34 = vrot.slane %v1066_v27, 6  ;;  %v543_v38 = vrot.slane %v1089_v39, 6  ;;  %s991_s0 = smov [#allocation3]  }
  0xfc   :  { %895 = vmatprep.subr.bf16.mxu1 %v894_v61  ;;  %889 = vmatpush1.bf16.msra.mxu0 %v888_v53  ;;  %v598_v53 = vld [vmem:[%s1390_s6 + $0x148] sm:$0xff]  ;;  %v567_v61 = vld [vmem:[%s1390_s6 + $0x50] sm:$0xff] }
  0xfd   :  { %897 = vmatpush1.bf16.msra.mxu1 %v896_v55  ;;  %899 = vmatprep.subr.bf16.mxu0 %v898_v57  ;;  %v584_v55 = vld [vmem:[%s1390_s6 + $0xd8] sm:$0xff]  ;;  %v948_v59 = vpack.c.bf16 %v598_v53, %v597_v50 }
  0xfe   :  { %931 = vmatprep.subr.bf16.mxu1 %v930_v62  ;;  %v616_v57 = vld [vmem:[%s1390_s6 + $0x1d8] sm:$0xff]  ;;  %v918_v60 = vpack.c.bf16 %v584_v55, %v583_v54 }
  0xff   :  { %790 = vmatmul.mubr.msk.f32.vlgmr.msra.gmra.mrb[8].mxu0 %vm390_vm7, %v387_v5  ;;  %v568_v62 = vld [vmem:[%s1390_s6 + $0x58] sm:$0xff]  ;;  %v950_v63 = vpack.c.bf16 %v616_v57, %v615_v56  ;;  %v552_v56 = vld [vmem:[#allocation3] sm:$0x1] }
 0x100   :  { %791 = vmatmul.mubr.msk.f32.vlgmr.msra.gmra.mrb[8].mxu1 %vm390_vm7, %v387_v5  ;;  %901 = vmatpush3.bf16.msra.mxu0 %v900_v6  ;;  %v920_v3 = vpack.c.bf16 %v568_v62, %v567_v61  ;;  %v585_v5 = vld [vmem:[%s1390_s6 + $0xe0] sm:$0xff]  ;;  %v586_v6 = vld [vmem:[%s1390_s6 + $0xe8] sm:$0xff] }
 0x101   :  { %933 = vmatpush3.bf16.msra.mxu1 %v932_v7  ;;  %903 = vmatprep.subr.bf16.mxu0 %v902_v8  ;;  %v617_v7 = vld [vmem:[%s1390_s6 + $0x1e0] sm:$0xff]  ;;  %v922_v8 = vpack.c.bf16 %v586_v6, %v585_v5 }
 0x102   :  { %935 = vmatprep.subr.bf16.mxu1 %v934_v12  ;;  %v954_v12 = vpack.c.bf16 %v618_v9, %v617_v7 }
 0x104   :  { %905 = vmatpush3.bf16.msra.mxu0 %v904_v18  ;;  %v588_v18 = vld [vmem:[%s1390_s6 + $0xf8] sm:$0xff] }
 0x105   :  { %937 = vmatpush3.bf16.msra.mxu1 %v936_v19  ;;  %907 = vmatprep.subr.bf16.mxu0 %v906_v20  ;;  %v619_v19 = vld [vmem:[%s1390_s6 + $0x1f0] sm:$0xff]  ;;  %v926_v20 = vpack.c.bf16 %v588_v18, %v587_v17  ;;  %s770_s6 = sshll.u32 %s991_s0, 4  ;;  %s771_s6 = int_to_ptr.vmem [resolvable:$true] %s770_s6 }
 0x106   :  { %939 = vmatprep.subr.bf16.mxu1 %v938_v24  ;;  %v958_v24 = vpack.c.bf16 %v620_v21, %v619_v19  ;;  %s965_s10 = scalar_lea.vmem %s771_s6, 16  ;;  %s969_s11 = scalar_lea.vmem %s771_s6, 32 }
 0x107   :  { %p966_p0 = scmp.ne.s32.totalorder %s771_s6, %s965_s10  ;;  %p970_p1 = scmp.lt.s32.totalorder %s771_s6, %s771_s6 }
 0x108   :  { %909 = vmatpush3.bf16.msra.mxu0 %v908_v31  ;;  %v540_v31 = vrot.slane %v1100_v45, 6  ;;  %p971_p2 = scmp.lt.s32.totalorder %s969_s11, %s965_s10 }
 0x109   :  { %941 = vmatpush3.bf16.msra.mxu1 %v940_v32  ;;  %911 = vmatprep.subr.bf16.mxu0 %v910_v33  ;;  %v542_v33 = vrot.slane %v1110_v51, 6 }
 0x10a   :  { %943 = vmatprep.subr.bf16.mxu1 %v942_v37  ;;  %p972_p3 = por %p971_p2, %p970_p1 }
 0x10c   :  { %913 = vmatpush3.bf16.msra.mxu0 %v912_v44  ;;  %p973_p4 = pnand %p972_p3, %p966_p0 }
 0x10d   :  { %945 = vmatpush3.bf16.msra.mxu1 %v944_v46  ;;  %915 = vmatprep.subr.bf16.mxu0 %v914_v47 }
 0x10e   :  { %947 = vmatprep.subr.bf16.mxu1 %v946_v52 }
 0x110   :  { %917 = vmatpush3.bf16.msra.mxu0 %v916_v58 }
 0x111   :  { %949 = vmatpush3.bf16.msra.mxu1 %v948_v59  ;;  %919 = vmatprep.subr.bf16.mxu0 %v918_v60 }
 0x112   :  { %951 = vmatprep.subr.bf16.mxu1 %v950_v63 }
 0x114   :  { %921 = vmatpush3.bf16.msra.mxu0 %v920_v3 }
 0x115   :  { %953 = vmatpush3.bf16.msra.mxu1 %v952_v4  ;;  %923 = vmatprep.subr.bf16.mxu0 %v922_v8 }
 0x116   :  { %955 = vmatprep.subr.bf16.mxu1 %v954_v12 }
 0x118   :  { %925 = vmatpush3.bf16.msra.mxu0 %v924_v13 }
 0x119   :  { %957 = vmatpush3.bf16.msra.mxu1 %v956_v16  ;;  %927 = vmatprep.subr.bf16.mxu0 %v926_v20 }
 0x11a   :  { %959 = vmatprep.subr.bf16.mxu1 %v958_v24 }
 0x11c   :  { %929 = vmatpush3.bf16.msra.mxu0 %v928_v25 }
 0x11d   :  { %961 = vmatpush3.bf16.msra.mxu1 %v960_v29 }
 0x1d2   :  { %v460_v32 = vpop.f32.mrb[8].mxu0 }
 0x1d3   :  { %v461_v35 = vadd.f32 %v460_v32, %v389_v30  ;;  %v531_v36 = vpop.f32.mrb[8].mxu1  ;;  %v462_v37 = vpop.f32.mrb[9].mxu0 }
 0x1d4   :  { %v532_v40 = vadd.f32 %v531_v36, %v389_v30  ;;  %v463_v41 = vadd.f32 %v462_v37, %v389_v30  ;;  %v533_v42 = vpop.f32.mrb[9].mxu1 }
 0x1d5   :  { %v548_v43 = vsub.f32 %v461_v35, %v540_v31  ;;  %v534_v44 = vadd.f32 %v533_v42, %v389_v30 }
 0x1d6   :  { %v550_v46 = vsub.f32 %v532_v40, %v542_v33  ;;  %v549_v47 = vsub.f32 %v463_v41, %v541_v34 }
 0x1d7   :  { %v551_v48 = vsub.f32 %v534_v44, %v543_v38  ;;  %v553_v45 = vmul.f32 %v548_v43, %v548_v43 }
 0x1d8   :  { %v554_v49 = vmul.f32 %v549_v47, %v549_v47  ;;  %v555_v52 = vmul.f32 %v550_v46, %v550_v46 }
 0x1d9   :  { %v556_v50 = vmul.f32 %v551_v48, %v551_v48 }
 0x1da   :  { %685 = vmatprep.mubr.f32.mxu0 %v554_v49 }
 0x1db   :  { %755 = vmatprep.mubr.f32.mxu1 %v556_v50  ;;  %686 = vmatmul.mubr.f32.vlgmr.msra.gmra.mrb[10].mxu0 %v553_v45 }
 0x1dc   :  { %756 = vmatmul.mubr.f32.vlgmr.msra.gmra.mrb[10].mxu1 %v555_v52 }
 0x2ae   :  { %v824_v27 = vpop.f32.mrb[10].mxu0 }
 0x2af   :  { %v859_v39 = vpop.f32.mrb[10].mxu1  ;;  %v825_v51 = vpop.f32.mrb[11].mxu0 }
 0x2b0   :  { %v826_v53 = vadd.f32 %v825_v51, %v824_v27  ;;  %v860_v54 = vpop.f32.mrb[11].mxu1 }
 0x2b1   :  { %v861_v55 = vadd.f32 %v860_v54, %v859_v39 }
 0x2b3   :  { %v758_v57 = vadd.f32 %v861_v55, %v826_v53 }
 0x2b5   :  { %v761_v58 = vadd.f32 %v758_v57, %v552_v56 }
 0x2b7   :  { %763 = vst.msk [vmem:[#allocation3] sm:$0x1] %vm32_vm8, %v761_v58 }
 0x2b8   :  { %976 = shalt.err (!%p973_p4)
}
 0x2b9   :  { %s977_s14 = scalar_lea.hbm %s1391_s7, 16 }
 0x2ba   :  { %p978_p5 = scmp.ne.s32.totalorder %s1391_s7, %s977_s14  ;;  %p981_p6 = scmp.lt.u32.totalorder %s977_s14, %s1391_s7 }
 0x2bc   :  { %p983_p7 = pnand %p981_p6, %p978_p5 }
 0x2be   :  { %986 = shalt.err (!%p983_p7)
}
 0x2bf   :  { %773 = dma.vmem_to_hbm [thread:$0]  %s771_s6, 16, %s1391_s7, [#allocation4]  }
 0x2c0   :  { %987 = dma.done.wait [#allocation4], 16  }
 0x2c1   :  { %988 = vsyncadd [#allocation4], 4294967280 }
 0x2c2   :  { %777 = vsyncpa [#allocation4], 1 }

</bundles_post_ra>
